<compile_context>
chip_gen: v7x
topology: tpu7x:2x2x1
jax: 0.10.0
libtpu: 0.0.40
codegen_flags: <defaults>
</compile_context>

<pallas_src>
import functools

import jax
import jax.numpy as jnp
from jax.experimental import pallas as pl
from jax.experimental.pallas import tpu as pltpu


def _vmem_capacity_bytes():
    """Physical per-core VMEM; falls back to the v7x 64 MiB if unknown."""
    try:
        info = pltpu.get_tpu_info()
        cap = int(getattr(info, "vmem_capacity_bytes", 0) or 0)
        if cap > 0:
            return cap
    except Exception:
        pass
    return 64 * 1024 * 1024


def _fsmn_kernel(x_ref, lh_ref, rh_ref, w_ref, o_ref, win_ref, *,
                 kernel_size, left, halo, slab, seq_len, tile_rows):
    """Depthwise time-conv + residual for one (batch row, time tile).

    x_ref:  (tT, D)        current time tile (also supplies the residual)
    lh_ref: (H, D)         H rows just before the tile (clamped fetch)
    rh_ref: (H, D)         H rows just after the tile (clamped fetch)
    w_ref:  (K, S, D) f32  pre-broadcast depthwise taps (resident)
    o_ref:  (tT, D)        output tile
    win_ref:(tT+2H, D) f32 assembled window scratch
    """
    K, H, S, tT = kernel_size, halo, slab, tile_rows
    f32 = jnp.float32
    ti = pl.program_id(1)
    n_t = pl.num_programs(1)

    # ---- assemble the [left halo | tile | right halo] window in f32 --------
    # Halo masking is unconditional (2*H rows, cheap): it realizes the
    # ConstantPad1d zeros and neutralizes clamped / OOB-padded halo fetches.
    row = jax.lax.broadcasted_iota(jnp.int32, (H, 1), 0)
    g_left = ti * tT - H + row
    win_ref[0:H, :] = jnp.where(g_left >= 0, lh_ref[...].astype(f32), 0.0)
    g_right = (ti + 1) * tT + row
    win_ref[H + tT:H + tT + H, :] = jnp.where(g_right < seq_len,
                                              rh_ref[...].astype(f32), 0.0)

    # Main tile: single conversion pass; the in-range mask runs only on the
    # last tile and only when the grid actually overhangs the sequence.
    if seq_len % tT != 0:
        @pl.when(ti != n_t - 1)
        def _():
            win_ref[H:H + tT, :] = x_ref[...].astype(f32)

        @pl.when(ti == n_t - 1)
        def _():
            g = ti * tT + jax.lax.broadcasted_iota(jnp.int32, (tT, 1), 0)
            win_ref[H:H + tT, :] = jnp.where(g < seq_len,
                                             x_ref[...].astype(f32), 0.0)
    else:
        win_ref[H:H + tT, :] = x_ref[...].astype(f32)

    # ---- depthwise conv + residual, one vreg-resident slab at a time -------
    off = H - left          # static, >= 0 by construction of H
    n_slabs = tT // S       # static

    def slab_body(si):
        r0 = si * S
        if not isinstance(si, int):
            r0 = pl.multiple_of(r0, S)
        # Aligned dynamic load of the slab's extended window (f32, no converts).
        wslab = win_ref[pl.ds(r0, S + 2 * H), :]
        acc = wslab[H:H + S, :]                        # residual term (x itself)
        for k in range(K):                             # K is small: static unroll
            acc = acc + w_ref[k] * wslab[off + k:off + k + S, :]
        o_ref[pl.ds(r0, S), :] = acc.astype(o_ref.dtype)

    if n_slabs <= 8:
        for si in range(n_slabs):                      # fully unrolled
            slab_body(si)
    else:
        pl.loop(0, n_slabs)(slab_body)


def fsmn_decoder_forward(inputs, weight, *, kernel_size, sanm_shfit=0,
                         max_tile_rows=None):
    """Equivalent of MultiHeadedAttentionSANMDecoder.forward (mask/cache=None).

    inputs: (B, T, D) or (T, D); weight: (D, 1, K) PyTorch depthwise layout.
    Returns (B, T, D) (2-D inputs are unsqueezed, matching the PyTorch module).
    """
    if inputs.ndim == 2:
        inputs = inputs[None]
    B, T, D = inputs.shape
    K = kernel_size

    left = (K - 1) // 2
    if sanm_shfit > 0:
        left = left + sanm_shfit
    right = K - 1 - left
    assert right >= 0, "sanm_shfit too large for this kernel_size"

    dtype = inputs.dtype
    itemsize = jnp.dtype(dtype).itemsize

    # Depthwise taps (D, 1, K) -> (K, D), kept in f32 (matches PyTorch conv
    # math and avoids per-tap converts in the kernel).
    w32 = jnp.transpose(weight[:, 0, :], (1, 0)).astype(jnp.float32)

    # ---- tile geometry ------------------------------------------------------
    # Halo rows: smallest multiple of 8 covering the conv overhang.
    H = max(8, -(-max(left, right, 1) // 8) * 8)
    # Slab rows per inner-loop step so the f32 accumulator stays in vregs.
    d_blocks = -(-D // 128)
    S = max(8, (64 // d_blocks) // 8 * 8)
    S = max(H, (S // H) * H)                           # keep H | S
    S = min(S, max(H, -(-T // H) * H))                 # don't exceed (padded) T
    if max_tile_rows is not None:                      # test hook: small tiles
        S = max(H, min(S, (max_tile_rows // H) * H))

    # Working-set budget: generation aware (~VMEM/4 -> ~16 MiB on v7x,
    # ~32 MiB on v5e/v6e); tiles beyond ~1K rows have diminishing returns.
    vmem_cap = _vmem_capacity_bytes()
    budget = max(8 << 20, vmem_cap // 4)
    per_row = D * (4 * itemsize + 4)                   # 2x-buffered in+out + f32 window
    fixed = 8 * H * D * itemsize + 2 * K * S * D * 4 + 2 * H * D * 4
    max_rows = max(S, (max(0, budget - fixed) // per_row) // S * S)
    max_rows = min(max_rows, max(S, (1024 // S) * S))
    if max_tile_rows is not None:
        max_rows = max(S, (max_tile_rows // S) * S)
    tT = min(max_rows, -(-T // S) * S)                 # time tile, multiple of S (and H)
    n_t = -(-T // tT)

    # v7x megacore: expose >= 2 steps on the parallel axes for non-trivial work.
    if B * n_t < 2 and T > 2 * S and B * T * D * itemsize > (256 << 10):
        half = -(-T // 2)
        tT = max(S, -(-half // S) * S)
        n_t = -(-T // tT)

    tH = tT // H
    n_hb = -(-T // H)

    # Pre-broadcast taps to (K, S, D): the inner loop sees plain (S, D) reads,
    # no per-tap broadcast_in_dim; block is resident across the whole grid.
    w_big = jnp.broadcast_to(w32[:, None, :], (K, S, D))

    kernel = functools.partial(_fsmn_kernel, kernel_size=K, left=left, halo=H,
                               slab=S, seq_len=T, tile_rows=tT)

    flops = 2 * B * T * D * K
    bytes_accessed = (2 * B * T * D + B * n_t * 2 * H * D) * itemsize + K * S * D * 4
    vmem_limit = max(32 << 20, min(vmem_cap * 3 // 4, 96 << 20))

    # TODO(synk): the mask / mask_shfit_chunk scaling and the cache-based
    # streaming path are unreachable from this forward signature
    # (mask=None, cache=None) and are not implemented.
    out = pl.pallas_call(
        kernel,
        out_shape=jax.ShapeDtypeStruct((B, T, D), dtype),
        grid_spec=pltpu.PrefetchScalarGridSpec(
            num_scalar_prefetch=0,
            grid=(B, n_t),
            in_specs=[
                # current time tile (also supplies the residual)
                pl.BlockSpec((None, tT, D), lambda bi, ti: (bi, ti, 0)),
                # H rows just before the tile (clamped at the front)
                pl.BlockSpec((None, H, D),
                             lambda bi, ti: (bi, jnp.maximum(ti * tH - 1, 0), 0)),
                # H rows just after the tile (clamped at the back)
                pl.BlockSpec((None, H, D),
                             lambda bi, ti: (bi, jnp.minimum((ti + 1) * tH, n_hb - 1), 0)),
                # pre-broadcast depthwise taps, resident across the grid
                pl.BlockSpec((K, S, D), lambda bi, ti: (0, 0, 0)),
            ],
            out_specs=pl.BlockSpec((None, tT, D), lambda bi, ti: (bi, ti, 0)),
            scratch_shapes=[pltpu.VMEM((tT + 2 * H, D), jnp.float32)],
        ),
        compiler_params=pltpu.CompilerParams(
            dimension_semantics=("parallel", "parallel"),
            vmem_limit_bytes=vmem_limit,
        ),
        cost_estimate=pl.CostEstimate(flops=flops, transcendentals=0,
                                      bytes_accessed=int(bytes_accessed)),
    )(inputs, inputs, inputs, w_big)
    return out


def reference_forward(inputs, weight, *, kernel_size, sanm_shfit=0):
    """Pure-JAX reference mirroring the PyTorch code path (sanity check)."""
    if inputs.ndim == 2:
        inputs = inputs[None]
    K = kernel_size
    left = (K - 1) // 2
    if sanm_shfit > 0:
        left = left + sanm_shfit
    right = K - 1 - left
    B, T, D = inputs.shape
    xp = jnp.pad(inputs.astype(jnp.float32), ((0, 0), (left, right), (0, 0)))
    out = jnp.zeros((B, T, D), dtype=jnp.float32)
    for k in range(K):
        out = out + weight[:, 0, k].astype(jnp.float32) * xp[:, k:k + T, :]
    return (out + inputs.astype(jnp.float32)).astype(inputs.dtype)


if __name__ == "__main__":
    n_feat = 32
    kernel_size = 11
    B, T = 2, 16

    key = jax.random.PRNGKey(0)
    k_in, k_w, k_in2, k_in3, k_in4 = jax.random.split(key, 5)
    inputs = jax.random.normal(k_in, (B, T, n_feat), dtype=jnp.float32)
    weight = jax.random.normal(k_w, (n_feat, 1, kernel_size), dtype=jnp.float32) * 0.1

    # Main path (small shape, one time tile per batch row).
    out = fsmn_decoder_forward(inputs, weight, kernel_size=kernel_size, sanm_shfit=0)
    out = jax.block_until_ready(out)
    ref = reference_forward(inputs, weight, kernel_size=kernel_size, sanm_shfit=0)
    assert out.shape == (B, T, n_feat)
    assert jnp.allclose(out, ref, atol=1e-5, rtol=1e-5)

    # Multi time-tile path with a remainder (masked) last tile + halo blocks.
    x2 = jax.random.normal(k_in2, (1, 40, n_feat), dtype=jnp.float32)
    out2 = jax.block_until_ready(
        fsmn_decoder_forward(x2, weight, kernel_size=kernel_size, sanm_shfit=0,
                             max_tile_rows=16))
    ref2 = reference_forward(x2, weight, kernel_size=kernel_size, sanm_shfit=0)
    assert jnp.allclose(out2, ref2, atol=1e-5, rtol=1e-5)

    # Asymmetric padding path (sanm_shfit > 0), exact multiple of the tile.
    x3 = jax.random.normal(k_in3, (3, 24, n_feat), dtype=jnp.float32)
    out3 = jax.block_until_ready(
        fsmn_decoder_forward(x3, weight, kernel_size=kernel_size, sanm_shfit=2,
                             max_tile_rows=8))
    ref3 = reference_forward(x3, weight, kernel_size=kernel_size, sanm_shfit=2)
    assert jnp.allclose(out3, ref3, atol=1e-5, rtol=1e-5)

    # Multi-slab inner loop (single tile split into vreg-resident slabs).
    D4, T4 = 128, 256
    w4 = jax.random.normal(k_w, (D4, 1, kernel_size), dtype=jnp.float32) * 0.1
    x4 = jax.random.normal(k_in4, (1, T4, D4), dtype=jnp.float32)
    out4 = jax.block_until_ready(
        fsmn_decoder_forward(x4, w4, kernel_size=kernel_size, sanm_shfit=0))
    ref4 = reference_forward(x4, w4, kernel_size=kernel_size, sanm_shfit=0)
    assert jnp.allclose(out4, ref4, atol=1e-4, rtol=1e-4)

    print("KERNEL_OK")
</pallas_src>

<mosaic_0001>
module attributes {stable_mosaic.version = 11 : i64} {
  func.func @_fsmn_kernel(%arg0: i32, %arg1: i32, %arg2: memref<1x16x32xf32, #tpu.memory_space<vmem>>, %arg3: memref<1x8x32xf32, #tpu.memory_space<vmem>>, %arg4: memref<1x8x32xf32, #tpu.memory_space<vmem>>, %arg5: memref<11x16x32xf32, #tpu.memory_space<vmem>>, %arg6: memref<1x16x32xf32, #tpu.memory_space<vmem>>, %arg7: memref<32x32xf32, #tpu.memory_space<vmem>>) attributes {dimension_semantics = [#tpu.dimension_semantics<parallel>, #tpu.dimension_semantics<parallel>], iteration_bounds = array<i64: 2, 1>, scalar_prefetch = 0 : i64, scratch_operands = 1 : i64, tpu.core_type = #tpu.core_type<tc>, window_params = [{transform_indices = @transform_0, window_bounds = array<i64: 1, 16, 32>}, {transform_indices = @transform_1, window_bounds = array<i64: 1, 8, 32>}, {transform_indices = @transform_2, window_bounds = array<i64: 1, 8, 32>}, {pipeline_mode = #tpu.pipeline_mode<synchronous>, transform_indices = @transform_3, window_bounds = array<i64: 11, 16, 32>}, {transform_indices = @transform_4, window_bounds = array<i64: 1, 16, 32>}]} {
    %0 = tpu.iota {dimensions = array<i32: 0>} : vector<8x1xi32>
    %c16_i32 = arith.constant 16 : i32
    %1 = arith.muli %arg1, %c16_i32 : i32
    %c8_i32 = arith.constant 8 : i32
    %2 = arith.subi %1, %c8_i32 : i32
    %3 = vector.broadcast %2 : i32 to vector<8x1xi32>
    %4 = arith.addi %3, %0 : vector<8x1xi32>
    %c0_i32 = arith.constant 0 : i32
    %5 = vector.broadcast %c0_i32 : i32 to vector<8x1xi32>
    %6 = arith.cmpi sge, %4, %5 : vector<8x1xi32>
    %c0 = arith.constant 0 : index
    %c0_0 = arith.constant 0 : index
    %c0_1 = arith.constant 0 : index
    %7 = vector.load %arg3[%c0, %c0_0, %c0_1] : memref<1x8x32xf32, #tpu.memory_space<vmem>>, vector<1x8x32xf32>
    %8 = vector.shape_cast %7 : vector<1x8x32xf32> to vector<8x32xf32>
    %cst = arith.constant 0.000000e+00 : f32
    %9 = vector.shape_cast %6 : vector<8x1xi1> to vector<8x1xi1>
    %10 = vector.broadcast %9 : vector<8x1xi1> to vector<8x32xi1>
    %11 = vector.broadcast %cst : f32 to vector<8x32xf32>
    %12 = arith.select %10, %8, %11 : vector<8x32xi1>, vector<8x32xf32>
    %c0_2 = arith.constant 0 : index
    %c0_3 = arith.constant 0 : index
    %13 = vector.load %arg7[%c0_2, %c0_3] : memref<32x32xf32, #tpu.memory_space<vmem>>, vector<8x32xf32>
    tpu.vector_store %arg7[%c0_2, %c0_3], %12 {strides = array<i32>} : memref<32x32xf32, #tpu.memory_space<vmem>>, vector<8x32xf32>,
    %c1_i32 = arith.constant 1 : i32
    %14 = arith.addi %arg1, %c1_i32 : i32
    %c16_i32_4 = arith.constant 16 : i32
    %15 = arith.muli %14, %c16_i32_4 : i32
    %16 = vector.broadcast %15 : i32 to vector<8x1xi32>
    %17 = arith.addi %16, %0 : vector<8x1xi32>
    %c16_i32_5 = arith.constant 16 : i32
    %18 = vector.broadcast %c16_i32_5 : i32 to vector<8x1xi32>
    %19 = arith.cmpi slt, %17, %18 : vector<8x1xi32>
    %c0_6 = arith.constant 0 : index
    %c0_7 = arith.constant 0 : index
    %c0_8 = arith.constant 0 : index
    %20 = vector.load %arg4[%c0_6, %c0_7, %c0_8] : memref<1x8x32xf32, #tpu.memory_space<vmem>>, vector<1x8x32xf32>
    %21 = vector.shape_cast %20 : vector<1x8x32xf32> to vector<8x32xf32>
    %cst_9 = arith.constant 0.000000e+00 : f32
    %22 = vector.shape_cast %19 : vector<8x1xi1> to vector<8x1xi1>
    %23 = vector.broadcast %22 : vector<8x1xi1> to vector<8x32xi1>
    %24 = vector.broadcast %cst_9 : f32 to vector<8x32xf32>
    %25 = arith.select %23, %21, %24 : vector<8x32xi1>, vector<8x32xf32>
    %c24 = arith.constant 24 : index
    %c0_10 = arith.constant 0 : index
    %26 = vector.load %arg7[%c24, %c0_10] : memref<32x32xf32, #tpu.memory_space<vmem>>, vector<8x32xf32>
    tpu.vector_store %arg7[%c24, %c0_10], %25 {strides = array<i32>} : memref<32x32xf32, #tpu.memory_space<vmem>>, vector<8x32xf32>,
    %c0_11 = arith.constant 0 : index
    %c0_12 = arith.constant 0 : index
    %c0_13 = arith.constant 0 : index
    %27 = vector.load %arg2[%c0_11, %c0_12, %c0_13] : memref<1x16x32xf32, #tpu.memory_space<vmem>>, vector<1x16x32xf32>
    %28 = vector.shape_cast %27 : vector<1x16x32xf32> to vector<16x32xf32>
    %c8 = arith.constant 8 : index
    %c0_14 = arith.constant 0 : index
    %29 = vector.load %arg7[%c8, %c0_14] : memref<32x32xf32, #tpu.memory_space<vmem>>, vector<16x32xf32>
    tpu.vector_store %arg7[%c8, %c0_14], %28 {strides = array<i32>} : memref<32x32xf32, #tpu.memory_space<vmem>>, vector<16x32xf32>,
    %c0_15 = arith.constant 0 : index
    %c0_16 = arith.constant 0 : index
    %30 = vector.load %arg7[%c0_15, %c0_16] : memref<32x32xf32, #tpu.memory_space<vmem>>, vector<32x32xf32>
    %31 = vector.extract_strided_slice %30 {offsets = [8, 0], sizes = [16, 32], strides = [1, 1]} : vector<32x32xf32> to vector<16x32xf32>
    %c0_17 = arith.constant 0 : index
    %c0_18 = arith.constant 0 : index
    %c0_19 = arith.constant 0 : index
    %32 = vector.load %arg5[%c0_17, %c0_18, %c0_19] : memref<11x16x32xf32, #tpu.memory_space<vmem>>, vector<1x16x32xf32>
    %33 = vector.shape_cast %32 : vector<1x16x32xf32> to vector<16x32xf32>
    %34 = vector.extract_strided_slice %30 {offsets = [3, 0], sizes = [16, 32], strides = [1, 1]} : vector<32x32xf32> to vector<16x32xf32>
    %35 = arith.mulf %33, %34 : vector<16x32xf32>
    %36 = arith.addf %31, %35 : vector<16x32xf32>
    %c1 = arith.constant 1 : index
    %c0_20 = arith.constant 0 : index
    %c0_21 = arith.constant 0 : index
    %37 = vector.load %arg5[%c1, %c0_20, %c0_21] : memref<11x16x32xf32, #tpu.memory_space<vmem>>, vector<1x16x32xf32>
    %38 = vector.shape_cast %37 : vector<1x16x32xf32> to vector<16x32xf32>
    %39 = vector.extract_strided_slice %30 {offsets = [4, 0], sizes = [16, 32], strides = [1, 1]} : vector<32x32xf32> to vector<16x32xf32>
    %40 = arith.mulf %38, %39 : vector<16x32xf32>
    %41 = arith.addf %36, %40 : vector<16x32xf32>
    %c2 = arith.constant 2 : index
    %c0_22 = arith.constant 0 : index
    %c0_23 = arith.constant 0 : index
    %42 = vector.load %arg5[%c2, %c0_22, %c0_23] : memref<11x16x32xf32, #tpu.memory_space<vmem>>, vector<1x16x32xf32>
    %43 = vector.shape_cast %42 : vector<1x16x32xf32> to vector<16x32xf32>
    %44 = vector.extract_strided_slice %30 {offsets = [5, 0], sizes = [16, 32], strides = [1, 1]} : vector<32x32xf32> to vector<16x32xf32>
    %45 = arith.mulf %43, %44 : vector<16x32xf32>
    %46 = arith.addf %41, %45 : vector<16x32xf32>
    %c3 = arith.constant 3 : index
    %c0_24 = arith.constant 0 : index
    %c0_25 = arith.constant 0 : index
    %47 = vector.load %arg5[%c3, %c0_24, %c0_25] : memref<11x16x32xf32, #tpu.memory_space<vmem>>, vector<1x16x32xf32>
    %48 = vector.shape_cast %47 : vector<1x16x32xf32> to vector<16x32xf32>
    %49 = vector.extract_strided_slice %30 {offsets = [6, 0], sizes = [16, 32], strides = [1, 1]} : vector<32x32xf32> to vector<16x32xf32>
    %50 = arith.mulf %48, %49 : vector<16x32xf32>
    %51 = arith.addf %46, %50 : vector<16x32xf32>
    %c4 = arith.constant 4 : index
    %c0_26 = arith.constant 0 : index
    %c0_27 = arith.constant 0 : index
    %52 = vector.load %arg5[%c4, %c0_26, %c0_27] : memref<11x16x32xf32, #tpu.memory_space<vmem>>, vector<1x16x32xf32>
    %53 = vector.shape_cast %52 : vector<1x16x32xf32> to vector<16x32xf32>
    %54 = vector.extract_strided_slice %30 {offsets = [7, 0], sizes = [16, 32], strides = [1, 1]} : vector<32x32xf32> to vector<16x32xf32>
    %55 = arith.mulf %53, %54 : vector<16x32xf32>
    %56 = arith.addf %51, %55 : vector<16x32xf32>
    %c5 = arith.constant 5 : index
    %c0_28 = arith.constant 0 : index
    %c0_29 = arith.constant 0 : index
    %57 = vector.load %arg5[%c5, %c0_28, %c0_29] : memref<11x16x32xf32, #tpu.memory_space<vmem>>, vector<1x16x32xf32>
    %58 = vector.shape_cast %57 : vector<1x16x32xf32> to vector<16x32xf32>
    %59 = vector.extract_strided_slice %30 {offsets = [8, 0], sizes = [16, 32], strides = [1, 1]} : vector<32x32xf32> to vector<16x32xf32>
    %60 = arith.mulf %58, %59 : vector<16x32xf32>
    %61 = arith.addf %56, %60 : vector<16x32xf32>
    %c6 = arith.constant 6 : index
    %c0_30 = arith.constant 0 : index
    %c0_31 = arith.constant 0 : index
    %62 = vector.load %arg5[%c6, %c0_30, %c0_31] : memref<11x16x32xf32, #tpu.memory_space<vmem>>, vector<1x16x32xf32>
    %63 = vector.shape_cast %62 : vector<1x16x32xf32> to vector<16x32xf32>
    %64 = vector.extract_strided_slice %30 {offsets = [9, 0], sizes = [16, 32], strides = [1, 1]} : vector<32x32xf32> to vector<16x32xf32>
    %65 = arith.mulf %63, %64 : vector<16x32xf32>
    %66 = arith.addf %61, %65 : vector<16x32xf32>
    %c7 = arith.constant 7 : index
    %c0_32 = arith.constant 0 : index
    %c0_33 = arith.constant 0 : index
    %67 = vector.load %arg5[%c7, %c0_32, %c0_33] : memref<11x16x32xf32, #tpu.memory_space<vmem>>, vector<1x16x32xf32>
    %68 = vector.shape_cast %67 : vector<1x16x32xf32> to vector<16x32xf32>
    %69 = vector.extract_strided_slice %30 {offsets = [10, 0], sizes = [16, 32], strides = [1, 1]} : vector<32x32xf32> to vector<16x32xf32>
    %70 = arith.mulf %68, %69 : vector<16x32xf32>
    %71 = arith.addf %66, %70 : vector<16x32xf32>
    %c8_34 = arith.constant 8 : index
    %c0_35 = arith.constant 0 : index
    %c0_36 = arith.constant 0 : index
    %72 = vector.load %arg5[%c8_34, %c0_35, %c0_36] : memref<11x16x32xf32, #tpu.memory_space<vmem>>, vector<1x16x32xf32>
    %73 = vector.shape_cast %72 : vector<1x16x32xf32> to vector<16x32xf32>
    %74 = vector.extract_strided_slice %30 {offsets = [11, 0], sizes = [16, 32], strides = [1, 1]} : vector<32x32xf32> to vector<16x32xf32>
    %75 = arith.mulf %73, %74 : vector<16x32xf32>
    %76 = arith.addf %71, %75 : vector<16x32xf32>
    %c9 = arith.constant 9 : index
    %c0_37 = arith.constant 0 : index
    %c0_38 = arith.constant 0 : index
    %77 = vector.load %arg5[%c9, %c0_37, %c0_38] : memref<11x16x32xf32, #tpu.memory_space<vmem>>, vector<1x16x32xf32>
    %78 = vector.shape_cast %77 : vector<1x16x32xf32> to vector<16x32xf32>
    %79 = vector.extract_strided_slice %30 {offsets = [12, 0], sizes = [16, 32], strides = [1, 1]} : vector<32x32xf32> to vector<16x32xf32>
    %80 = arith.mulf %78, %79 : vector<16x32xf32>
    %81 = arith.addf %76, %80 : vector<16x32xf32>
    %c10 = arith.constant 10 : index
    %c0_39 = arith.constant 0 : index
    %c0_40 = arith.constant 0 : index
    %82 = vector.load %arg5[%c10, %c0_39, %c0_40] : memref<11x16x32xf32, #tpu.memory_space<vmem>>, vector<1x16x32xf32>
    %83 = vector.shape_cast %82 : vector<1x16x32xf32> to vector<16x32xf32>
    %84 = vector.extract_strided_slice %30 {offsets = [13, 0], sizes = [16, 32], strides = [1, 1]} : vector<32x32xf32> to vector<16x32xf32>
    %85 = arith.mulf %83, %84 : vector<16x32xf32>
    %86 = arith.addf %81, %85 : vector<16x32xf32>
    %c0_41 = arith.constant 0 : index
    %c0_42 = arith.constant 0 : index
    %c0_43 = arith.constant 0 : index
    %87 = vector.load %arg6[%c0_41, %c0_42, %c0_43] : memref<1x16x32xf32, #tpu.memory_space<vmem>>, vector<1x16x32xf32>
    %88 = vector.shape_cast %87 : vector<1x16x32xf32> to vector<16x32xf32>
    %89 = vector.shape_cast %86 : vector<16x32xf32> to vector<1x16x32xf32>
    tpu.vector_store %arg6[%c0_41, %c0_42, %c0_43], %89 {strides = array<i32>} : memref<1x16x32xf32, #tpu.memory_space<vmem>>, vector<1x16x32xf32>,
    return
  }
  func.func @transform_0(%arg0: i32, %arg1: i32) -> (i32, i32, i32) {
    %c0_i32 = arith.constant 0 : i32
    %c0_i32_0 = arith.constant 0 : i32
    return %arg0, %arg1, %c0_i32 : i32, i32, i32
  }
  func.func @transform_1(%arg0: i32, %arg1: i32) -> (i32, i32, i32) {
    %c2_i32 = arith.constant 2 : i32
    %0 = arith.muli %arg1, %c2_i32 : i32
    %c1_i32 = arith.constant 1 : i32
    %1 = arith.subi %0, %c1_i32 : i32
    %c0_i32 = arith.constant 0 : i32
    %2 = arith.maxsi %1, %c0_i32 : i32
    %c0_i32_0 = arith.constant 0 : i32
    %c0_i32_1 = arith.constant 0 : i32
    return %arg0, %2, %c0_i32_0 : i32, i32, i32
  }
  func.func @transform_2(%arg0: i32, %arg1: i32) -> (i32, i32, i32) {
    %c1_i32 = arith.constant 1 : i32
    %0 = arith.addi %arg1, %c1_i32 : i32
    %c2_i32 = arith.constant 2 : i32
    %1 = arith.muli %0, %c2_i32 : i32
    %c1_i32_0 = arith.constant 1 : i32
    %2 = arith.minsi %1, %c1_i32_0 : i32
    %c0_i32 = arith.constant 0 : i32
    %c0_i32_1 = arith.constant 0 : i32
    return %arg0, %2, %c0_i32 : i32, i32, i32
  }
  func.func @transform_3(%arg0: i32, %arg1: i32) -> (i32, i32, i32) {
    %c0_i32 = arith.constant 0 : i32
    %c0_i32_0 = arith.constant 0 : i32
    %c0_i32_1 = arith.constant 0 : i32
    %c0_i32_2 = arith.constant 0 : i32
    return %c0_i32, %c0_i32_0, %c0_i32_1 : i32, i32, i32
  }
  func.func @transform_4(%arg0: i32, %arg1: i32) -> (i32, i32, i32) {
    %c0_i32 = arith.constant 0 : i32
    %c0_i32_0 = arith.constant 0 : i32
    return %arg0, %arg1, %c0_i32 : i32, i32, i32
  }
}

</mosaic_0001>

<bundles_post_ra>
// kernel: tpu_custom_call.1
= control target key start
LH: loop header
LB: loop body
LE: loop exit
PB: predicated region body
PF: predicated region fallthrough
CT: control target
= control target key end

     0   :  { %s1447_s0 = inlined_call_operand.hbm [shape: f32[2,16,32], index: 0, kind: input, shape index: {}]   ;;  %s1448_s1 = inlined_call_operand.hbm [shape: f32[2,16,32], index: 1, kind: input, shape index: {}]   ;;  %s1449_s2 = inlined_call_operand.hbm [shape: f32[2,16,32], index: 2, kind: input, shape index: {}]   ;;  %s1450_s3 = inlined_call_operand.hbm [shape: f32[11,16,32], index: 3, kind: input, shape index: {}]   ;;  %s1451_s4 = inlined_call_operand.hbm [shape: f32[2,16,32], index: 4, kind: output, shape index: {}]  }
   0x1   :  { %1468 = sst [smem:[#allocation22_spill]] %s1448_s1 }
   0x2   :  { %9 = vsyncpa [#allocation4], 0 }
   0x3   :  { %11 = vsyncpa [#allocation4 + $0x1], 0 }
   0x4   :  { %12 = vsyncpa [#allocation7], 0 }
   0x5   :  { %14 = vsyncpa [#allocation7 + $0x1], 0 }
   0x6   :  { %15 = vsyncpa [#allocation10], 0 }
   0x7   :  { %16 = vsyncpa [#allocation5], 0 }
   0x8   :  { %18 = vsyncpa [#allocation5 + $0x1], 0  ;;  %s1064_s15 = smov 0   ;;  %s1066_s16 = smov 0  }
   0x9   :  { %s1068_s17 = smov 0   ;;  %s1070_s18 = smov 0  }
   0xa   :  { %s1072_s19 = smov 0   ;;  %s1074_s20 = smov 0  }
   0xb LB: > { %1469 = sst [smem:[#allocation16_spill]] %s1015_s17  ;;  %s36_s21 = sadd.s32 1, %s1023_s19  ;;  %s1027_s20 = sphi %s1074_s20, %s24_s20   ;;  %s1023_s19 = sphi %s1072_s19, %s1501_s19   ;;  %s1019_s18 = sphi %s1070_s18, %s1500_s18   ;;  %s1015_s17 = sphi %s1068_s17, %s1499_s17   ;;  %s1011_s16 = sphi %s1066_s16, %s1503_s16   ;;  %s1007_s15 = sphi %s1064_s15, %s1502_s15  }
   0xc   : > { %1470 = sst [smem:[#allocation17_spill]] %s1023_s19  ;;  %s45_s22 = sadd.s32 1, %s1015_s17 }
   0xd   : > { %1471 = sst [smem:[#allocation18_spill]] %s1027_s20  ;;  %p38_p0 = scmp.ge.s32.totalorder %s36_s21, 2 }
   0xe   : > { %p1452_p1 = scmp.ne.s32.totalorder %s1015_s17, %s1011_s16  ;;  %p53_p2 = scmp.eq.s32.totalorder %s1027_s20, 0 }
   0xf   : > { %s1505_s21 = smov (%p38_p0, %s36_s21), 0  ;;  %p762_p5 = scmp.lt.s32.totalorder %s1027_s20, 2 }
  0x10   : > { %1472 = sst [smem:[#allocation19_spill]] %s1505_s21  ;;  %p54_p4 = por %p53_p2, %p1452_p1 }
  0x11   : > { %s40_s23 = ssub.s32 %s1023_s19, %s1505_s21  ;;  %s1109_s24 = sand.u32 1, %s1015_s17  }
  0x12   : > { %p43_p6 = scmp.eq.s32.totalorder %s40_s23, 0  ;;  %s1112_s25 = sshll.u32 %s1023_s19, 8 }
  0x13   : > { %s1118_s28 = scalar_lea.hbm %s1447_s0, %s1112_s25  ;;  %p1120_p7 = pnand %p762_p5, %p54_p4 }
  0x14   : > { %s1125_s30 = scalar_select %p43_p6, %s1015_s17, %s45_s22  }
  0x15   : > { %s1473_s29 = scalar_select %p1120_p7, 1, 0 }
  0x16   : > { %1474 = sst [smem:[#allocation20_spill]] %s1125_s30  ;;  %s239_s5 = sand.u32 1, %s1027_s20  }
  0x17   : > { %s1453_s6 = sshll.u32 %s1109_s24, 3  ;;  %s1475_s1 = sld [smem:[#allocation22_spill]] }
  0x18   : > { %s243_s10 = scalar_lea.vmem [#allocation6], %s1453_s6  ;;  %s1139_s12 = scalar_lea.sflag [#allocation7], %s239_s5 }
  0x19   : > { %s256_s11 = sshll.u32 %s243_s10, 4  ;;  %p1145_p9 = pneg %p1120_p7  ;;  %s1137_s11 = int_to_ptr.vmem [resolvable:$true] %s256_s11 }
  0x1b   : > { %s1476_s14 = scalar_select %p1145_p9, 1, 0 }
  0x1d   : > { %s1133_s9 = scalar_lea.hbm %s1475_s1, %s1112_s25  ;;  %s824_s26 = scalar_lea.hbm %s1475_s1, 512 }
  0x1e   : > { %s819_s13 = scalar_lea.hbm %s1133_s9, 128  ;;  %p825_p12 = scmp.lt.u32.totalorder %s1133_s9, %s1475_s1 }
  0x1f   : > { %p820_p8 = scmp.ne.s32.totalorder %s1133_s9, %s819_s13  ;;  %p826_p13 = scmp.lt.u32.totalorder %s824_s26, %s819_s13 }
  0x20   : > { %p828_p2 = scmp.lt.u32.totalorder %s819_s13, %s1133_s9 }
  0x21   : > { %p822_p10 = pnand %p1145_p9, %p820_p8  ;;  %p827_p0 = por %p826_p13, %p825_p12 }
  0x23   : > { %p823_p11 = pneg %p822_p10  ;;  %p829_p4 = por %p828_p2, %p827_p0 }
  0x25   : > { %p830_p5 = pnand %p829_p4, %p823_p11 }
  0x27   : > { %833 = shalt.err (!%p830_p5)
}
  0x28   : > { %s834_s5 = scalar_lea.vmem %s1137_s11, 128  ;;  %s1029_s8 = smov [#allocation6]  }
  0x29   : > { %p835_p6 = scmp.ne.s32.totalorder %s1137_s11, %s834_s5  ;;  %s839_s10 = sshll.u32 %s1029_s8, 4  ;;  %s840_s10 = int_to_ptr.vmem [resolvable:$false] %s839_s10 }
  0x2a   : > { %s841_s22 = scalar_lea.vmem %s840_s10, 256  ;;  %p842_p3 = scmp.lt.s32.totalorder %s1137_s11, %s840_s10 }
  0x2b   : > { %p837_p8 = pnand %p835_p6, %p1145_p9  ;;  %p843_p1 = scmp.lt.s32.totalorder %s841_s22, %s834_s5 }
  0x2d   : > { %p838_p10 = pneg %p837_p8  ;;  %p844_p12 = por %p843_p1, %p842_p3 }
  0x2f   : > { %p845_p13 = pnand %p844_p12, %p838_p10 }
  0x31   : > { %848 = shalt.err (!%p845_p13)
}
  0x32   : > { %753 = dma.hbm_to_vmem [thread:$0]  (!%p1120_p7), %s1133_s9, 128, %s1137_s11, %s1139_s12  }
  0x33   : > { %s1170_s13 = sadd.s32 4294967295, %s1027_s20   ;;  %s701_s23 = sadd.s32 4294967294, %s1027_s20  }
  0x34   : > { %p58_p1 = scmp.ne.s32.totalorder %s1011_s16, %s1007_s15  ;;  %p1459_p3 = scmp.eq.s32.totalorder %s1170_s13, 0 }
  0x35   : > { %p177_p11 = scmp.eq.s32.totalorder %s1170_s13, 1  ;;  %p183_p0 = scmp.eq.s32.totalorder %s701_s23, 1 }
  0x36   : > { %p702_p2 = scmp.ge.s32.totalorder %s1027_s20, 1  ;;  %p1180_p4 = por %p1459_p3, %p58_p1 }
  0x37   : > { %p1478_p5 = scmp.ne.s32.totalorder %s1015_s17, %s1011_s16  ;;  %p1191_p8 = por %p183_p0, %p58_p1 }
  0x38   : > { %s1477_s26 = scalar_select %p1180_p4, 1, 0 }
  0x39   : > { %p1187_p6 = por %p177_p11, %p1478_p5  ;;  %p190_p10 = scmp.lt.s32.totalorder %s1027_s20, 3 }
  0x3a   : > { %s1480_s11 = scalar_select %p1191_p8, 1, 0 }
  0x3b   : > { %s1479_s9 = scalar_select %p1187_p6, 1, 0 }
  0x3c   : > { %1481 = sst [smem:[#allocation21_spill]] %s1480_s11  ;;  %p1196_p12 = pnand %p702_p2, %p190_p10 }
  0x3d   : > { %s1030_s7 = smov [#allocation9]   ;;  %s705_s8 = sshll.u32 %s1109_s24, 4 }
  0x3e   : > { %s1482_s27 = scalar_select %p1196_p12, 1, 0 }
  0x3f   : > { %s202_s5 = sshll.u32 %s1030_s7, 4  ;;  %p743_p13 = pneg %p1196_p12  ;;  %s1200_s5 = int_to_ptr.vmem [resolvable:$true] %s202_s5 }
  0x40   : > { %s220_s22 = scalar_lea.vmem [#allocation3], %s705_s8  ;;  %s849_s7 = scalar_lea.hbm %s1450_s3, 2816 }
  0x41   : > { %p1207_p11 = pnand %p743_p13, %p1459_p3  ;;  %s229_s23 = sshll.u32 %s220_s22, 4  ;;  %s1212_s23 = int_to_ptr.vmem [resolvable:$true] %s229_s23 }
  0x42   : > { %p850_p1 = scmp.ne.s32.totalorder %s1450_s3, %s849_s7  ;;  %p856_p10 = scmp.lt.u32.totalorder %s849_s7, %s1450_s3 }
  0x43   : > { %p851_p0 = pneg %p1207_p11 }
  0x45   : > { %p852_p2 = pnand %p851_p0, %p850_p1 }
  0x47   : > { %p853_p5 = pneg %p852_p2 }
  0x49   : > { %p858_p13 = pnand %p856_p10, %p853_p5 }
  0x4b   : > { %861 = shalt.err (!%p858_p13)
}
  0x4c   : > { %s862_s8 = scalar_lea.vmem %s1200_s5, 2816  ;;  %p870_p4 = scmp.lt.s32.totalorder %s1200_s5, %s1200_s5 }
  0x4d   : > { %p863_p3 = scmp.ne.s32.totalorder %s1200_s5, %s862_s8  ;;  %p871_p12 = scmp.lt.s32.totalorder %s862_s8, %s862_s8 }
  0x4f   : > { %p865_p8 = pnand %p863_p3, %p851_p0  ;;  %p872_p7 = por %p871_p12, %p870_p4 }
  0x51   : > { %p866_p6 = pneg %p865_p8 }
  0x53   : > { %p873_p9 = pnand %p872_p7, %p866_p6 }
  0x55   : > { %876 = shalt.err (!%p873_p9)
}
  0x56   : > { %s1031_s1 = smov 128   ;;  %s1032_s17 = smov 8  }
  0x57   : > { %746 = dma.hbm_to_vmem [thread:$0]  (!%p1207_p11), %s1450_s3, 2816, %s1200_s5, [#allocation10], %s1031_s1, %s1031_s1, %s1032_s17  }
  0x58   : > { %s217_s21 = scalar_lea.sflag [#allocation4], %s1109_s24  ;;  %s877_s30 = scalar_lea.hbm %s1118_s28, 256 }
  0x59   : > { %p878_p7 = scmp.ne.s32.totalorder %s1118_s28, %s877_s30  ;;  %p1484_p9 = scmp.ne.s32.totalorder %s1476_s14, 0 }
  0x5a   : > { %s882_s8 = scalar_lea.hbm %s1447_s0, 512  ;;  %p883_p6 = scmp.lt.u32.totalorder %s1118_s28, %s1447_s0 }
  0x5b   : > { %p880_p3 = pnand %p878_p7, %p1484_p9  ;;  %p884_p8 = scmp.lt.u32.totalorder %s882_s8, %s877_s30 }
  0x5c   : > { %p886_p1 = scmp.lt.u32.totalorder %s877_s30, %s1118_s28 }
  0x5d   : > { %p881_p4 = pneg %p880_p3  ;;  %p885_p12 = por %p884_p8, %p883_p6 }
  0x5f   : > { %p887_p0 = por %p886_p1, %p885_p12 }
  0x61   : > { %p888_p2 = pnand %p887_p0, %p881_p4 }
  0x63   : > { %891 = shalt.err (!%p888_p2)
}
  0x64   : > { %s892_s5 = scalar_lea.vmem %s1212_s23, 256  ;;  %s1033_s10 = smov [#allocation3]  }
  0x65   : > { %p893_p11 = scmp.ne.s32.totalorder %s1212_s23, %s892_s5  ;;  %s897_s19 = sshll.u32 %s1033_s10, 4  ;;  %s898_s19 = int_to_ptr.vmem [resolvable:$false] %s897_s19 }
  0x66   : > { %s899_s6 = scalar_lea.vmem %s898_s19, 512  ;;  %p900_p13 = scmp.lt.s32.totalorder %s1212_s23, %s898_s19 }
  0x67   : > { %p895_p5 = pnand %p893_p11, %p1484_p9  ;;  %p901_p7 = scmp.lt.s32.totalorder %s899_s6, %s892_s5 }
  0x69   : > { %p896_p10 = pneg %p895_p5  ;;  %p902_p3 = por %p901_p7, %p900_p13 }
  0x6b   : > { %p903_p6 = pnand %p902_p3, %p896_p10 }
  0x6d   : > { %906 = shalt.err (!%p903_p6)
}
  0x6e   : > { %p1485_p4 = scmp.ne.s32.totalorder %s1473_s29, 0  ;;  %s1486_s11 = sadd.s32 128, %s1112_s25 }
  0x6f   : > { %s1270_s22 = scalar_lea.hbm %s1449_s2, %s1486_s11  ;;  %s1487_s7 = sshll.u32 %s1109_s24, 3 }
  0x70   : > { %750 = dma.hbm_to_vmem [thread:$0]  (!%p1485_p4), %s1118_s28, 256, %s1212_s23, %s217_s21, %s1031_s1, %s1031_s1, %s1032_s17  }
  0x71   : > { %s267_s8 = scalar_lea.vmem [#allocation8], %s1487_s7  ;;  %s907_s10 = scalar_lea.hbm %s1270_s22, 128 }
  0x72   : > { %s280_s5 = sshll.u32 %s267_s8, 4  ;;  %p908_p8 = scmp.ne.s32.totalorder %s1270_s22, %s907_s10  ;;  %s281_s5 = int_to_ptr.vmem [resolvable:$true] %s280_s5 }
  0x73   : > { %s912_s23 = scalar_lea.hbm %s1449_s2, 512  ;;  %p913_p0 = scmp.lt.u32.totalorder %s1270_s22, %s1449_s2 }
  0x74   : > { %p910_p12 = pnand %p908_p8, %p1484_p9  ;;  %p914_p2 = scmp.lt.u32.totalorder %s912_s23, %s907_s10 }
  0x75   : > { %p916_p5 = scmp.lt.u32.totalorder %s907_s10, %s1270_s22 }
  0x76   : > { %p911_p1 = pneg %p910_p12  ;;  %p915_p11 = por %p914_p2, %p913_p0 }
  0x78   : > { %p917_p10 = por %p916_p5, %p915_p11 }
  0x7a   : > { %p918_p13 = pnand %p917_p10, %p911_p1 }
  0x7c   : > { %921 = shalt.err (!%p918_p13)
}
  0x7d   : > { %s922_s24 = scalar_lea.vmem %s281_s5, 128  ;;  %s1034_s21 = smov [#allocation8]  }
  0x7e   : > { %p923_p7 = scmp.ne.s32.totalorder %s281_s5, %s922_s24  ;;  %s927_s19 = sshll.u32 %s1034_s21, 4  ;;  %s928_s19 = int_to_ptr.vmem [resolvable:$false] %s927_s19 }
  0x7f   : > { %s929_s6 = scalar_lea.vmem %s928_s19, 256  ;;  %p930_p8 = scmp.lt.s32.totalorder %s281_s5, %s928_s19 }
  0x80   : > { %p925_p3 = pnand %p923_p7, %p1484_p9  ;;  %p931_p12 = scmp.lt.s32.totalorder %s929_s6, %s922_s24 }
  0x82   : > { %p926_p6 = pneg %p925_p3  ;;  %p932_p4 = por %p931_p12, %p930_p8 }
  0x84   : > { %p933_p0 = pnand %p932_p4, %p926_p6 }
  0x86   : > { %936 = shalt.err (!%p933_p0)
}
  0x87   : > { %p1488_p2 = scmp.ne.s32.totalorder %s1473_s29, 0  ;;  %p1489_p1 = scmp.ne.s32.totalorder %s1482_s27, 0 }
  0x88   : > { %s1295_s14 = sand.u32 (!%p1489_p1), 1, %s1011_s16   ;;  %p1490_p9 = scmp.ne.s32.totalorder (!%p1489_p1), %s1477_s26, 0 }
  0x89   : > { %756 = dma.hbm_to_vmem [thread:$0]  (!%p1488_p2), %s1270_s22, 128, %s281_s5, %s1139_s12  }
  0x8a   : > { %289 = sbr.rel (%p1489_p1) target bundleno = 205 (0xcd), region = 36  ;;  %s715_s11 = sshll.u32 (!%p1489_p1), %s1295_s14, 4 }
  0x8b   : > { %s292_s20 = scalar_lea.sflag (!%p1489_p1), [#allocation4], %s1295_s14  ;;  %s295_s30 = scalar_lea.vmem (!%p1489_p1), [#allocation3], %s715_s11 }
  0x91   : > { %990 = dma.done.wait (%p1490_p9), %s292_s20, 256  }
  0x92   : > { %992 = vsyncadd (%p1490_p9), %s292_s20, 4294967040  ;;  %s300_s29 = sand.u32 1, %s1170_s13  }
  0x93   : > { %s301_s12 = scalar_lea.sflag [#allocation7], %s300_s29 }
  0x94   : > { %994 = dma.done.wait (%p1490_p9), %s301_s12, 256  }
  0x95   : > { %996 = vsyncadd (%p1490_p9), %s301_s12, 4294967040  ;;  %p1491_p4 = scmp.eq.s32.totalorder %s1170_s13, 0 }
  0x97   : > { %998 = dma.done.wait (%p1491_p4), [#allocation10], 2816   ;;  %p1492_p11 = pmov %p1491_p4 }
  0x98   : > { %vm373_vm0 = vcmask 261120   ;;  %v1035_v0 = vmov 0.0   ;;  %v385_v1 = vld [vmem:[%s295_s30] sm:$0xff]  ;;  %v386_v2 = vld [vmem:[%s295_s30 + $0x8] sm:$0xff]  ;;  %vm398_vm1 = vcmask 1044480   ;;  %vm413_vm2 = vcmask 1043456  }
  0x99   : > { %1000 = vsyncadd (%p1492_p11), [#allocation10], 4294964480  ;;  %374 = vst.msk [vmem:[#allocation2] sm:$0xff] %vm373_vm0, %v1035_v0  ;;  %vm428_vm3 = vcmask 1042432   ;;  %vm443_vm4 = vcmask 1041408   ;;  %v393_v10 = vld [vmem:[#allocation9] sm:$0xff] }
  0x9a   : > { %384 = vst.msk [vmem:[#allocation2 + $0x18] sm:$0xff] %vm373_vm0, %v1035_v0  ;;  %387 = vst.msk [vmem:[#allocation2 + $0x8] sm:$0xff] %vm373_vm0, %v385_v1  ;;  %v394_v11 = vld [vmem:[#allocation9 + $0x8] sm:$0xff]  ;;  %v411_v23 = vld [vmem:[#allocation9 + $0x10] sm:$0xff]  ;;  %vm458_vm5 = vcmask 1040384   ;;  %vm481_vm6 = vcmask 1046528  }
  0x9b   : > { %388 = vst.msk [vmem:[#allocation2 + $0x10] sm:$0xff] %vm373_vm0, %v386_v2  ;;  %v412_v24 = vld [vmem:[#allocation9 + $0x18] sm:$0xff]  ;;  %v426_v29 = vld [vmem:[#allocation9 + $0x20] sm:$0xff]  ;;  %v427_v30 = vld [vmem:[#allocation9 + $0x28] sm:$0xff]  ;;  %vm496_vm7 = vcmask 1045504   ;;  %s351_s13 = scalar_lea.vmem [#allocation11], %s715_s11 }
  0x9c   : > { %v441_v39 = vld [vmem:[#allocation9 + $0x30] sm:$0xff]  ;;  %v442_v40 = vld [vmem:[#allocation9 + $0x38] sm:$0xff]  ;;  %v456_v49 = vld [vmem:[#allocation9 + $0x40] sm:$0xff]  ;;  %s556_s26 = sshll.u32 %s351_s13, 4  ;;  %s729_s27 = sshll.u32 %s1019_s18, 8  ;;  %s1391_s26 = int_to_ptr.vmem [resolvable:$true] %s556_s26 }
  0x9d   : > { %v457_v50 = vld [vmem:[#allocation9 + $0x48] sm:$0xff]  ;;  %v471_v59 = vld [vmem:[#allocation9 + $0x50] sm:$0xff]  ;;  %v472_v62 = vld [vmem:[#allocation9 + $0x58] sm:$0xff]  ;;  %s1396_s8 = scalar_lea.hbm %s1451_s4, %s729_s27  ;;  %s541_s18 = scalar_lea.sflag [#allocation5], %s1295_s14 }
  0x9e   : > { %s937_s5 = scalar_lea.vmem %s1391_s26, 256  ;;  %p1493_p10 = scmp.ne.s32.totalorder %s1479_s9, 0 }
  0x9f   : > { %p938_p5 = scmp.ne.s32.totalorder %s1391_s26, %s937_s5  ;;  %s1036_s10 = smov [#allocation11]  }
  0xa0   : > { %v389_v3 = vld [vmem:[#allocation2] sm:$0xff]  ;;  %s941_s28 = sshll.u32 %s1036_s10, 4  ;;  %s942_s28 = int_to_ptr.vmem [resolvable:$false] %s941_s28 }
  0xa1   : > { %v399_v4 = vrot.slane %v389_v3, 3  ;;  %v414_v5 = vrot.slane %v389_v3, 4  ;;  %v1318_v6 = vld [vmem:[#allocation2 + $0x8] sm:$0xff]  ;;  %v429_v8 = vrot.slane %v389_v3, 5  ;;  %v444_v9 = vrot.slane %v389_v3, 6  ;;  %v1330_v20 = vld [vmem:[#allocation2 + $0x18] sm:$0xff]  ;;  %p939_p13 = pnand %p938_p5, %p1493_p10  ;;  %p944_p3 = scmp.lt.s32.totalorder %s1391_s26, %s942_s28 }
  0xa2   : > { %v1320_v7 = vld [vmem:[#allocation2 + $0x10] sm:$0xff]  ;;  %v400_v12 = vrot.slane %v1318_v6, 3  ;;  %v415_v14 = vrot.slane %v1318_v6, 4  ;;  %v430_v16 = vrot.slane %v1318_v6, 5  ;;  %v445_v18 = vrot.slane %v1318_v6, 6  ;;  %s943_s25 = scalar_lea.vmem %s942_s28, 512 }
  0xa3   : > { %v402_v13 = vrot.slane %v1320_v7, 3  ;;  %v417_v15 = vrot.slane %v1320_v7, 4  ;;  %v432_v17 = vrot.slane %v1320_v7, 5  ;;  %v447_v19 = vrot.slane %v1320_v7, 6  ;;  %p940_p7 = pneg %p939_p13  ;;  %p945_p6 = scmp.lt.s32.totalorder %s943_s25, %s937_s5 }
  0xa4   : > { %v401_v21 = vsel %vm398_vm1, %v399_v4, %v400_v12  ;;  %v416_v25 = vsel %vm413_vm2, %v414_v5, %v415_v14  ;;  %v431_v31 = vsel %vm428_vm3, %v429_v8, %v430_v16  ;;  %v459_v33 = vrot.slane %v389_v3, 7  ;;  %v478_v4 = vld [vmem:[#allocation9 + $0x60] sm:$0xff]  ;;  %v479_v8 = vld [vmem:[#allocation9 + $0x68] sm:$0xff] }
  0xa5   : > { %v1336_v22 = vsel %vm398_vm1, %v400_v12, %v402_v13  ;;  %v1342_v26 = vsel %vm413_vm2, %v415_v14, %v417_v15  ;;  %v406_v27 = vmul.f32 %v401_v21, %v393_v10  ;;  %v1349_v32 = vsel %vm428_vm3, %v430_v16, %v432_v17  ;;  %v495_v21 = vld [vmem:[#allocation9 + $0x78] sm:$0xff]  ;;  %p946_p8 = por %p945_p6, %p944_p3 }
  0xa6   : > { %v407_v28 = vmul.f32 %v1336_v22, %v394_v11  ;;  %v485_v34 = vrot.slane %v1330_v20, 1  ;;  %v421_v37 = vmul.f32 %v416_v25, %v411_v23  ;;  %v422_v38 = vmul.f32 %v1342_v26, %v412_v24 }
  0xa7   : > { %v408_v35 = vadd.f32 %v406_v27, %v1318_v6  ;;  %v446_v41 = vsel %vm443_vm4, %v444_v9, %v445_v18  ;;  %v448_v42 = vsel %vm443_vm4, %v445_v18, %v447_v19  ;;  %v460_v43 = vrot.slane %v1318_v6, 7  ;;  %v494_v18 = vld [vmem:[#allocation9 + $0x70] sm:$0xff]  ;;  %p947_p12 = pnand %p946_p8, %p940_p7 }
  0xa8   : > { %v409_v36 = vadd.f32 %v407_v28, %v1320_v7  ;;  %v462_v44 = vrot.slane %v1320_v7, 7  ;;  %v436_v47 = vmul.f32 %v431_v31, %v426_v29  ;;  %v437_v48 = vmul.f32 %v1349_v32, %v427_v30  ;;  %v509_v30 = vld [vmem:[#allocation9 + $0x80] sm:$0xff]  ;;  %v510_v31 = vld [vmem:[#allocation9 + $0x88] sm:$0xff] }
  0xa9   : > { %v423_v45 = vadd.f32 %v421_v37, %v408_v35  ;;  %v461_v51 = vsel %vm458_vm5, %v459_v33, %v460_v43  ;;  %v482_v53 = vrot.slane %v1318_v6, 1  ;;  %v483_v54 = vrot.slane %v1320_v7, 1 }
  0xaa   : > { %v424_v46 = vadd.f32 %v422_v38, %v409_v36  ;;  %v463_v52 = vsel %vm458_vm5, %v460_v43, %v462_v44  ;;  %v451_v57 = vmul.f32 %v446_v41, %v441_v39  ;;  %v452_v58 = vmul.f32 %v448_v42, %v442_v40  ;;  %v519_v38 = vld [vmem:[#allocation9 + $0x90] sm:$0xff]  ;;  %v520_v39 = vld [vmem:[#allocation9 + $0x98] sm:$0xff] }
  0xab   : > { %v438_v55 = vadd.f32 %v436_v47, %v423_v45  ;;  %v497_v60 = vrot.slane %v1318_v6, 2  ;;  %v498_v61 = vrot.slane %v1320_v7, 2  ;;  %v500_v63 = vrot.slane %v1330_v20, 2  ;;  %v530_v45 = vld [vmem:[#allocation9 + $0xa8] sm:$0xff] }
  0xac   : > { %v439_v56 = vadd.f32 %v437_v48, %v424_v46  ;;  %v466_v2 = vmul.f32 %v461_v51, %v456_v49  ;;  %v467_v3 = vmul.f32 %v463_v52, %v457_v50  ;;  %v484_v5 = vsel %vm481_vm6, %v482_v53, %v483_v54 }
  0xad   : > { %v453_v0 = vadd.f32 %v451_v57, %v438_v55  ;;  %v486_v9 = vsel %vm481_vm6, %v483_v54, %v485_v34  ;;  %v511_v10 = vrot.slane %v1330_v20, 3  ;;  %v473_v14 = vmul.f32 %v471_v59, %v1318_v6 }
  0xae   : > { %v454_v1 = vadd.f32 %v452_v58, %v439_v56  ;;  %v474_v16 = vmul.f32 %v472_v62, %v1320_v7  ;;  %v499_v19 = vsel %vm496_vm7, %v497_v60, %v498_v61  ;;  %v501_v23 = vsel %vm496_vm7, %v498_v61, %v500_v63 }
  0xaf   : > { %v468_v11 = vadd.f32 %v466_v2, %v453_v0  ;;  %v521_v24 = vrot.slane %v1330_v20, 4  ;;  %v489_v27 = vmul.f32 %v484_v5, %v478_v4  ;;  %v490_v29 = vmul.f32 %v486_v9, %v479_v8 }
  0xb0   : > { %v469_v12 = vadd.f32 %v467_v3, %v454_v1  ;;  %v512_v6 = vsel %vm398_vm1, %v402_v13, %v511_v10  ;;  %v531_v33 = vrot.slane %v1330_v20, 5  ;;  %v504_v35 = vmul.f32 %v499_v19, %v494_v18  ;;  %v529_v13 = vld [vmem:[#allocation9 + $0xa0] sm:$0xff] }
  0xb1   : > { %v475_v25 = vadd.f32 %v473_v14, %v468_v11  ;;  %v505_v37 = vmul.f32 %v501_v23, %v495_v21  ;;  %v522_v40 = vsel %vm413_vm2, %v417_v15, %v521_v24  ;;  %v514_v42 = vmul.f32 %v509_v30, %v1336_v22 }
  0xb2   : > { %v476_v28 = vadd.f32 %v474_v16, %v469_v12  ;;  %v515_v44 = vmul.f32 %v512_v6, %v510_v31  ;;  %v532_v20 = vsel %vm428_vm3, %v432_v17, %v531_v33  ;;  %v524_v47 = vmul.f32 %v519_v38, %v1342_v26 }
  0xb3   : > { %v491_v34 = vadd.f32 %v489_v27, %v475_v25  ;;  %v525_v15 = vmul.f32 %v522_v40, %v520_v39  ;;  %v534_v49 = vmul.f32 %v529_v13, %v1349_v32  ;;  %v535_v51 = vmul.f32 %v532_v20, %v530_v45 }
  0xb4   : > { %v492_v36 = vadd.f32 %v490_v29, %v476_v28 }
  0xb5   : > { %v506_v41 = vadd.f32 %v504_v35, %v491_v34 }
  0xb6   : > { %v507_v43 = vadd.f32 %v505_v37, %v492_v36 }
  0xb7   : > { %v516_v46 = vadd.f32 %v514_v42, %v506_v41 }
  0xb8   : > { %v517_v48 = vadd.f32 %v515_v44, %v507_v43 }
  0xb9   : > { %v526_v22 = vadd.f32 %v524_v47, %v516_v46 }
  0xba   : > { %v527_v50 = vadd.f32 %v525_v15, %v517_v48 }
  0xbb   : > { %v536_v7 = vadd.f32 %v534_v49, %v526_v22 }
  0xbc   : > { %v537_v17 = vadd.f32 %v535_v51, %v527_v50 }
  0xbd   : > { %538 = vst.msk [vmem:[%s351_s13] sm:$0xff] %vm373_vm0, %v536_v7 }
  0xbe   : > { %539 = vst.msk [vmem:[%s351_s13 + $0x8] sm:$0xff] %vm373_vm0, %v537_v17 }
  0xbf   : > { %950 = shalt.err (!%p947_p12)
}
  0xc0   : > { %s951_s23 = scalar_lea.hbm %s1396_s8, 256  ;;  %s955_s24 = scalar_lea.hbm %s1451_s4, 512 }
  0xc1   : > { %p952_p0 = scmp.ne.s32.totalorder %s1396_s8, %s951_s23  ;;  %p956_p9 = scmp.lt.u32.totalorder %s1396_s8, %s1451_s4 }
  0xc2   : > { %p957_p4 = scmp.lt.u32.totalorder %s955_s24, %s951_s23  ;;  %p959_p5 = scmp.lt.u32.totalorder %s951_s23, %s1396_s8 }
  0xc3   : > { %p953_p2 = pnand %p952_p0, %p1493_p10 }
  0xc4   : > { %p958_p11 = por %p957_p4, %p956_p9 }
  0xc5   : > { %p954_p1 = pneg %p953_p2 }
  0xc6   : > { %p960_p13 = por %p959_p5, %p958_p11 }
  0xc8   : > { %p961_p7 = pnand %p960_p13, %p954_p1 }
  0xca   : > { %964 = shalt.err (!%p961_p7)
}
  0xcb   : > { %s1037_s6 = smov 128   ;;  %s1038_s11 = smov 8  }
  0xcc   : > { %741 = dma.vmem_to_hbm [thread:$0]  (%p1493_p10), %s1391_s26, 256, %s1396_s8, %s541_s18, %s1037_s6, %s1037_s6, %s1038_s11  }
  0xcd PF: > { %s1494_s20 = sld [smem:[#allocation21_spill]]  ;;  %s1495_s30 = sld [smem:[#allocation18_spill]] }
  0xce   : > { %s571_s29 = sand.u32 1, %s1007_s15  }
  0xcf   : > { %s572_s12 = scalar_lea.sflag [#allocation5], %s571_s29 }
  0xd3   : > { %p1496_p3 = scmp.ne.s32.totalorder %s1494_s20, 0  ;;  %p1497_p6 = scmp.ge.s32.totalorder %s1495_s30, 2 }
  0xd5   : > { %p758_p8 = pnand %p1497_p6, %p1496_p3 }
  0xd7   : > { %1002 = dma.done.wait (!%p758_p8), %s572_s12, 256  }
  0xd8   : > { %1004 = vsyncadd (!%p758_p8), %s572_s12, 4294967040  ;;  %s24_s20 = sadd.s32 1, %s1495_s30   ;;  %s1498_s13 = sld [smem:[#allocation16_spill]] }
  0xd9   : > { %p21_p12 = scmp.ge.s32.totalorder %s24_s20, 4   ;;  %s1499_s17 = sld [smem:[#allocation20_spill]] }
  0xda   : > { %s1500_s18 = sld [smem:[#allocation17_spill]]  ;;  %s1501_s19 = sld [smem:[#allocation19_spill]] }
  0xdb   : > { %s1502_s15 = smov %s1011_s16  ;;  %23 = sbr.rel (!%p21_p12) target bundleno = 11 (0xb), region = 119 }
  0xde   : > { %s1503_s16 = smov %s1498_s13 }
  0xe2   :  { %577 = vsyncpa [#allocation4], 1 }
  0xe3   :  { %579 = vsyncpa [#allocation4 + $0x1], 1 }
  0xe4   :  { %580 = vsyncpa [#allocation7], 1 }
  0xe5   :  { %582 = vsyncpa [#allocation7 + $0x1], 1 }
  0xe6   :  { %583 = vsyncpa [#allocation10], 1 }
  0xe7   :  { %584 = vsyncpa [#allocation5], 1 }
  0xe8   :  { %586 = vsyncpa [#allocation5 + $0x1], 1 }

</bundles_post_ra>
